<compile_context>
chip_gen: v7x
topology: tpu7x:2x2x1
jax: 0.10.0
libtpu: 0.0.40
codegen_flags: <defaults>
</compile_context>

<pallas_src>
import numpy as np

import jax
import jax.numpy as jnp
from jax.experimental import pallas as pl
from jax.experimental.pallas import tpu as pltpu

BN_EPS = 1e-5
NEG_SLOPE = 0.1            # LeakyReLU slope of BottleneckCSP.act


# ----------------------------------------------------------------------------
# In-kernel activation helpers
# ----------------------------------------------------------------------------
def _silu(y):
    # y * sigmoid(y); sigmoid via the exact tanh identity -> single EUP op.
    return y * (0.5 + 0.5 * jnp.tanh(0.5 * y))


def _leaky_relu(y):
    return jnp.where(y > 0, y, NEG_SLOPE * y)


# ----------------------------------------------------------------------------
# Fused BottleneckCSP kernel: one grid step == one image, layout (C, H*W)
# ----------------------------------------------------------------------------
def _make_csp_kernel(H, W, c_, c2):
    HW = H * W
    PAD = W + 1            # halo so every 3x3 tap offset (oy*W + ox) stays in-bounds

    def kernel(x_ref,
               w12_ref, b12_ref,          # [cv1 ; cv2] fused against x  (2c_, c1)
               wm1_ref, bm1_ref,          # m[0].cv1        (BN folded)
               wm2_ref, bm2_ref,          # m[0].cv2 3x3 flattened (c_, 9*c_)
               w3_ref, b3_ref,            # cv3 + its half of post-concat BN
               w4_ref, b4_ref,            # cv4 on the (virtual) concat (c2, 2c_)
               o_ref,
               hp_ref):                   # VMEM scratch: zero-halo padded h
        f32 = jnp.float32
        bf16 = jnp.bfloat16
        xb = x_ref[0].astype(bf16)                                        # (c1, HW)

        # --- cv1 (SiLU branch) and cv2 (plain branch) share x: ONE matmul ------
        t = jnp.dot(w12_ref[...], xb, preferred_element_type=f32) + b12_ref[...]
        a = _silu(t[:c_])                     # cv1: conv+BN+SiLU
        z2 = _leaky_relu(t[c_:])              # cv2: conv + post-concat-BN half + LeakyReLU

        # --- Bottleneck.cv1: 1x1 conv + BN + SiLU ------------------------------
        h = _silu(jnp.dot(wm1_ref[...], a.astype(bf16),
                          preferred_element_type=f32) + bm1_ref[...])

        # --- Bottleneck.cv2: 3x3 conv (pad=1) + BN + SiLU ----------------------
        # h goes once into a padded VMEM scratch whose two (W+1)-lane halos are
        # zero; each tap is a statically shifted lane-slice.  Horizontal wrap is
        # masked on the ACTIVATIONS, the 9 masked slices are stacked into a
        # (9*c_, HW) im2col operand and contracted with the flattened 3x3 weight
        # in a single MXU matmul.
        zero_halo = jnp.zeros((c_, PAD), f32)
        hp_ref[:, pl.ds(0, PAD)] = zero_halo
        hp_ref[:, pl.ds(PAD + HW, PAD)] = zero_halo
        hp_ref[:, pl.ds(PAD, HW)] = h

        lane = jax.lax.broadcasted_iota(jnp.int32, (1, HW), 1)
        col = lane % W
        has_left = col >= 1
        has_right = col < (W - 1)

        taps = []
        for tap in range(9):                                   # static unroll
            oy, ox = tap // 3 - 1, tap % 3 - 1
            hs = hp_ref[:, pl.ds(PAD + oy * W + ox, HW)]
            if ox == -1:
                hs = jnp.where(has_left, hs, 0.0)
            elif ox == 1:
                hs = jnp.where(has_right, hs, 0.0)
            taps.append(hs)
        im2col = jnp.concatenate(taps, axis=0).astype(bf16)    # (9*c_, HW)
        mb = _silu(jnp.dot(wm2_ref[...], im2col,
                           preferred_element_type=f32) + bm2_ref[...])

        # --- Bottleneck shortcut add (c_ == c_) --------------------------------
        y = a + mb

        # --- cv3 (+ its half of the post-concat BN) + LeakyReLU ----------------
        z1 = _leaky_relu(jnp.dot(w3_ref[...], y.astype(bf16),
                                 preferred_element_type=f32) + b3_ref[...])

        # --- cv4 on the never-materialized concat: ONE (c2, 2c_) matmul --------
        z = jnp.concatenate([z1, z2], axis=0).astype(bf16)     # (2c_, HW)
        o = jnp.dot(w4_ref[...], z, preferred_element_type=f32) + b4_ref[...]
        o_ref[0] = _silu(o).astype(o_ref.dtype)

    return kernel


def bottleneck_csp_forward(x_nchw, params):
    """Fused BottleneckCSP forward (n=1, shortcut=True, g=1).  x is NCHW, f32."""
    N, c1, H, W = x_nchw.shape
    HW = H * W
    c_ = params['wm1'].shape[0]
    c2 = params['w4'].shape[0]

    x3 = x_nchw.reshape(N, c1, HW)       # channels on sublanes, H*W on lanes

    def const_spec(shape):
        return pl.BlockSpec(shape, lambda n, _nd=len(shape): (0,) * _nd)

    # Explicit VMEM budget: double-buffered f32 I/O blocks + bf16 weights +
    # padded scratch + headroom for live intermediates (a/h/im2col/z...).
    wts_bytes = 2 * (2 * c_ * c1 + c_ * c_ + c_ * 9 * c_ + c_ * c_ + c2 * 2 * c_)
    bias_bytes = 4 * (2 * c_ + 3 * c_ + c2)
    est = (2 * 4 * (c1 + c2) * HW                      # in/out blocks (double buffered)
           + 2 * (wts_bytes + bias_bytes)              # weight/bias blocks
           + 4 * c_ * (HW + 2 * (W + 1))               # padded 3x3 scratch
           + 4 * (9 * c_ + 8 * c_ + c1 + c2) * HW)     # live intermediates headroom
    vmem_limit = int(min(96 * 1024 * 1024, max(32 * 1024 * 1024, 2 * est)))

    out = pl.pallas_call(
        _make_csp_kernel(H, W, c_, c2),
        out_shape=jax.ShapeDtypeStruct((N, c2, HW), x_nchw.dtype),
        grid=(N,),
        in_specs=[
            pl.BlockSpec((1, c1, HW), lambda n: (n, 0, 0)),
            const_spec((2 * c_, c1)), const_spec((2 * c_, 1)),          # cv1|cv2 fused
            const_spec((c_, c_)), const_spec((c_, 1)),                  # m.cv1
            const_spec((c_, 9 * c_)), const_spec((c_, 1)),              # m.cv2 3x3 flat
            const_spec((c_, c_)), const_spec((c_, 1)),                  # cv3 (+BN half)
            const_spec((c2, 2 * c_)), const_spec((c2, 1)),              # cv4 (whole)
        ],
        out_specs=pl.BlockSpec((1, c2, HW), lambda n: (n, 0, 0)),
        scratch_shapes=[pltpu.VMEM((c_, HW + 2 * (W + 1)), jnp.float32)],
        compiler_params=pltpu.CompilerParams(
            dimension_semantics=("parallel",),
            vmem_limit_bytes=vmem_limit),
    )(x3,
      params['w12'], params['b12'],
      params['wm1'], params['bm1'],
      params['wm2'], params['bm2'],
      params['w3'], params['b3'],
      params['w4'], params['b4'])

    return out.reshape(N, c2, H, W)


# ----------------------------------------------------------------------------
# Synthetic parameters (PyTorch layouts) + folding into the fused kernel form
# ----------------------------------------------------------------------------
def _fold_bn(gamma, beta, mean, var):
    scale = gamma / jnp.sqrt(var + BN_EPS)
    return scale, beta - mean * scale


def _rand_bn(key, c):
    k1, k2, k3, k4 = jax.random.split(key, 4)
    gamma = 1.0 + 0.1 * jax.random.normal(k1, (c,), jnp.float32)
    beta = 0.1 * jax.random.normal(k2, (c,), jnp.float32)
    mean = 0.1 * jax.random.normal(k3, (c,), jnp.float32)
    var = 1.0 + 0.1 * jax.random.uniform(k4, (c,), jnp.float32)
    return gamma, beta, mean, var


def init_bottleneck_csp_params(key, c1, c2, e=0.5):
    c_ = int(c2 * e)
    ks = jax.random.split(key, 11)

    def w2d(k, cout, cin):
        return 0.1 * jax.random.normal(k, (cout, cin), jnp.float32)

    def w4d(k, cout, cin):
        return 0.1 * jax.random.normal(k, (cout, cin, 3, 3), jnp.float32)

    raw = {
        'cv1_w': w2d(ks[0], c_, c1), 'cv1_bn': _rand_bn(ks[1], c_),
        'm_cv1_w': w2d(ks[2], c_, c_), 'm_cv1_bn': _rand_bn(ks[3], c_),
        'm_cv2_w': w4d(ks[4], c_, c_), 'm_cv2_bn': _rand_bn(ks[5], c_),
        'cv3_w': w2d(ks[6], c_, c_),                  # plain conv, no BN
        'cv2_w': w2d(ks[7], c_, c1),                  # plain conv, no BN
        'post_bn': _rand_bn(ks[8], 2 * c_),           # BN over the channel concat
        'cv4_w': w2d(ks[9], c2, 2 * c_), 'cv4_bn': _rand_bn(ks[10], c2),
    }

    bf16 = jnp.bfloat16
    p = {}

    # cv1 (its own BN) and cv2 (second half of the post-concat BN) share x:
    # stack them so the kernel can do a single matmul against x.
    s1, b1 = _fold_bn(*raw['cv1_bn'])
    sp, bp = _fold_bn(*raw['post_bn'])
    w1 = s1[:, None] * raw['cv1_w']
    w2 = sp[c_:, None] * raw['cv2_w']
    p['w12'] = jnp.concatenate([w1, w2], axis=0).astype(bf16)        # (2c_, c1)
    p['b12'] = jnp.concatenate([b1, bp[c_:]], axis=0)[:, None]       # (2c_, 1) f32

    s, b = _fold_bn(*raw['m_cv1_bn'])
    p['wm1'] = (s[:, None] * raw['m_cv1_w']).astype(bf16)
    p['bm1'] = b[:, None]

    s, b = _fold_bn(*raw['m_cv2_bn'])
    w = s[:, None, None, None] * raw['m_cv2_w']                      # (c_, c_, 3, 3) OIHW
    # flatten to (c_, 9*c_) with column index (ky*3+kx)*c_ + cin  (matches im2col order)
    p['wm2'] = w.transpose(0, 2, 3, 1).reshape(c_, 9 * c_).astype(bf16)
    p['bm2'] = b[:, None]

    # cv3 gets the first half of the post-concat BN folded in.
    p['w3'] = (sp[:c_, None] * raw['cv3_w']).astype(bf16)
    p['b3'] = bp[:c_][:, None]

    s, b = _fold_bn(*raw['cv4_bn'])
    p['w4'] = (s[:, None] * raw['cv4_w']).astype(bf16)               # (c2, 2c_)
    p['b4'] = b[:, None]
    return p, raw


# ----------------------------------------------------------------------------
# Pure-JAX reference of BottleneckCSP.forward (inference-mode BN, f32)
# ----------------------------------------------------------------------------
def _ref_forward(x, raw):
    def bn(y, stats):
        s, b = _fold_bn(*stats)
        return y * s[None, :, None, None] + b[None, :, None, None]

    def conv1x1(y, w):
        return jnp.einsum('nchw,oc->nohw', y, w)

    def conv3x3(y, w):
        return jax.lax.conv_general_dilated(
            y, w, window_strides=(1, 1), padding=((1, 1), (1, 1)),
            dimension_numbers=('NCHW', 'OIHW', 'NCHW'))

    def silu(y):
        return y * jax.nn.sigmoid(y)

    a = silu(bn(conv1x1(x, raw['cv1_w']), raw['cv1_bn']))            # cv1
    h = silu(bn(conv1x1(a, raw['m_cv1_w']), raw['m_cv1_bn']))        # m[0].cv1
    mb = silu(bn(conv3x3(h, raw['m_cv2_w']), raw['m_cv2_bn']))       # m[0].cv2
    y = a + mb                                                       # shortcut
    y1 = conv1x1(y, raw['cv3_w'])                                    # cv3
    y2 = conv1x1(x, raw['cv2_w'])                                    # cv2
    z = bn(jnp.concatenate([y1, y2], axis=1), raw['post_bn'])
    z = jnp.where(z > 0, z, NEG_SLOPE * z)                           # LeakyReLU(0.1)
    return silu(bn(conv1x1(z, raw['cv4_w']), raw['cv4_bn']))         # cv4


if __name__ == "__main__":
    key = jax.random.PRNGKey(0)
    kx, kp = jax.random.split(key)

    N, C1, H, W = 2, 4, 16, 16
    C2 = 8                                    # e=0.5 -> c_ = 4

    x = jax.random.normal(kx, (N, C1, H, W), jnp.float32)
    params, raw = init_bottleneck_csp_params(kp, C1, C2, e=0.5)

    fwd = jax.jit(bottleneck_csp_forward)
    out = fwd(x, params)
    jax.block_until_ready(out)

    assert out.shape == (N, C2, H, W)
    assert out.dtype == jnp.float32

    # Check the fused kernel against the pure-JAX f32 reference of the PyTorch
    # graph (tolerance covers the bf16 matmul operands; accumulation is f32).
    ref = _ref_forward(x, raw)
    np.testing.assert_allclose(np.asarray(out), np.asarray(ref), atol=2e-2, rtol=2e-2)

    print("KERNEL_OK")
</pallas_src>

<mosaic_0001>
module attributes {stable_mosaic.version = 11 : i64} {
  func.func @kernel(%arg0: i32, %arg1: memref<1x4x256xf32, #tpu.memory_space<vmem>>, %arg2: memref<8x4xbf16, #tpu.memory_space<vmem>>, %arg3: memref<8x1xf32, #tpu.memory_space<vmem>>, %arg4: memref<4x4xbf16, #tpu.memory_space<vmem>>, %arg5: memref<4x1xf32, #tpu.memory_space<vmem>>, %arg6: memref<4x36xbf16, #tpu.memory_space<vmem>>, %arg7: memref<4x1xf32, #tpu.memory_space<vmem>>, %arg8: memref<4x4xbf16, #tpu.memory_space<vmem>>, %arg9: memref<4x1xf32, #tpu.memory_space<vmem>>, %arg10: memref<8x8xbf16, #tpu.memory_space<vmem>>, %arg11: memref<8x1xf32, #tpu.memory_space<vmem>>, %arg12: memref<1x8x256xf32, #tpu.memory_space<vmem>>, %arg13: memref<4x290xf32, #tpu.memory_space<vmem>>) attributes {dimension_semantics = [#tpu.dimension_semantics<parallel>], iteration_bounds = array<i64: 2>, scalar_prefetch = 0 : i64, scratch_operands = 1 : i64, tpu.core_type = #tpu.core_type<tc>, window_params = [{transform_indices = @transform_0, window_bounds = array<i64: 1, 4, 256>}, {pipeline_mode = #tpu.pipeline_mode<synchronous>, transform_indices = @transform_1, window_bounds = array<i64: 8, 4>}, {pipeline_mode = #tpu.pipeline_mode<synchronous>, transform_indices = @transform_2, window_bounds = array<i64: 8, 1>}, {pipeline_mode = #tpu.pipeline_mode<synchronous>, transform_indices = @transform_3, window_bounds = array<i64: 4, 4>}, {pipeline_mode = #tpu.pipeline_mode<synchronous>, transform_indices = @transform_4, window_bounds = array<i64: 4, 1>}, {pipeline_mode = #tpu.pipeline_mode<synchronous>, transform_indices = @transform_5, window_bounds = array<i64: 4, 36>}, {pipeline_mode = #tpu.pipeline_mode<synchronous>, transform_indices = @transform_6, window_bounds = array<i64: 4, 1>}, {pipeline_mode = #tpu.pipeline_mode<synchronous>, transform_indices = @transform_7, window_bounds = array<i64: 4, 4>}, {pipeline_mode = #tpu.pipeline_mode<synchronous>, transform_indices = @transform_8, window_bounds = array<i64: 4, 1>}, {pipeline_mode = #tpu.pipeline_mode<synchronous>, transform_indices = @transform_9, window_bounds = array<i64: 8, 8>}, {pipeline_mode = #tpu.pipeline_mode<synchronous>, transform_indices = @transform_10, window_bounds = array<i64: 8, 1>}, {transform_indices = @transform_11, window_bounds = array<i64: 1, 8, 256>}]} {
    %c0 = arith.constant 0 : index
    %c0_0 = arith.constant 0 : index
    %c0_1 = arith.constant 0 : index
    %0 = vector.load %arg1[%c0, %c0_0, %c0_1] : memref<1x4x256xf32, #tpu.memory_space<vmem>>, vector<1x4x256xf32>
    %1 = vector.shape_cast %0 : vector<1x4x256xf32> to vector<4x256xf32>
    %2 = arith.truncf %1 : vector<4x256xf32> to vector<4x256xbf16>
    %c0_2 = arith.constant 0 : index
    %c0_3 = arith.constant 0 : index
    %3 = vector.load %arg2[%c0_2, %c0_3] : memref<8x4xbf16, #tpu.memory_space<vmem>>, vector<8x4xbf16>
    %cst = arith.constant dense<0.000000e+00> : vector<8x256xf32>
    %4 = tpu.matmul %3, %2, %cst {dimension_numbers = #tpu.dot_dimension_numbers<[1], [0], [0], [1], [0, 0, 1, 1], [], []>} : vector<8x4xbf16>, vector<4x256xbf16>, vector<8x256xf32> -> vector<8x256xf32>
    %c0_4 = arith.constant 0 : index
    %c0_5 = arith.constant 0 : index
    %5 = vector.load %arg3[%c0_4, %c0_5] : memref<8x1xf32, #tpu.memory_space<vmem>>, vector<8x1xf32>
    %6 = vector.broadcast %5 : vector<8x1xf32> to vector<8x256xf32>
    %7 = arith.addf %4, %6 : vector<8x256xf32>
    %8 = vector.extract_strided_slice %7 {offsets = [0, 0], sizes = [4, 256], strides = [1, 1]} : vector<8x256xf32> to vector<4x256xf32>
    %cst_6 = arith.constant 5.000000e-01 : f32
    %9 = vector.broadcast %cst_6 : f32 to vector<4x256xf32>
    %10 = arith.mulf %9, %8 : vector<4x256xf32>
    %11 = math.tanh %10 : vector<4x256xf32>
    %cst_7 = arith.constant 5.000000e-01 : f32
    %12 = vector.broadcast %cst_7 : f32 to vector<4x256xf32>
    %13 = arith.mulf %12, %11 : vector<4x256xf32>
    %cst_8 = arith.constant 5.000000e-01 : f32
    %14 = vector.broadcast %cst_8 : f32 to vector<4x256xf32>
    %15 = arith.addf %14, %13 : vector<4x256xf32>
    %16 = arith.mulf %8, %15 : vector<4x256xf32>
    %17 = vector.extract_strided_slice %7 {offsets = [4, 0], sizes = [4, 256], strides = [1, 1]} : vector<8x256xf32> to vector<4x256xf32>
    %cst_9 = arith.constant 0.000000e+00 : f32
    %18 = vector.broadcast %cst_9 : f32 to vector<4x256xf32>
    %19 = arith.cmpf ogt, %17, %18 : vector<4x256xf32>
    %cst_10 = arith.constant 1.000000e-01 : f32
    %20 = vector.broadcast %cst_10 : f32 to vector<4x256xf32>
    %21 = arith.mulf %20, %17 : vector<4x256xf32>
    %22 = arith.select %19, %17, %21 : vector<4x256xi1>, vector<4x256xf32>
    %c0_11 = arith.constant 0 : index
    %c0_12 = arith.constant 0 : index
    %23 = vector.load %arg4[%c0_11, %c0_12] : memref<4x4xbf16, #tpu.memory_space<vmem>>, vector<4x4xbf16>
    %24 = arith.truncf %16 : vector<4x256xf32> to vector<4x256xbf16>
    %cst_13 = arith.constant dense<0.000000e+00> : vector<4x256xf32>
    %25 = tpu.matmul %23, %24, %cst_13 {dimension_numbers = #tpu.dot_dimension_numbers<[1], [0], [0], [1], [0, 0, 1, 1], [], []>} : vector<4x4xbf16>, vector<4x256xbf16>, vector<4x256xf32> -> vector<4x256xf32>
    %c0_14 = arith.constant 0 : index
    %c0_15 = arith.constant 0 : index
    %26 = vector.load %arg5[%c0_14, %c0_15] : memref<4x1xf32, #tpu.memory_space<vmem>>, vector<4x1xf32>
    %27 = vector.broadcast %26 : vector<4x1xf32> to vector<4x256xf32>
    %28 = arith.addf %25, %27 : vector<4x256xf32>
    %cst_16 = arith.constant 5.000000e-01 : f32
    %29 = vector.broadcast %cst_16 : f32 to vector<4x256xf32>
    %30 = arith.mulf %29, %28 : vector<4x256xf32>
    %31 = math.tanh %30 : vector<4x256xf32>
    %cst_17 = arith.constant 5.000000e-01 : f32
    %32 = vector.broadcast %cst_17 : f32 to vector<4x256xf32>
    %33 = arith.mulf %32, %31 : vector<4x256xf32>
    %cst_18 = arith.constant 5.000000e-01 : f32
    %34 = vector.broadcast %cst_18 : f32 to vector<4x256xf32>
    %35 = arith.addf %34, %33 : vector<4x256xf32>
    %36 = arith.mulf %28, %35 : vector<4x256xf32>
    %cst_19 = arith.constant 0.000000e+00 : f32
    %37 = vector.broadcast %cst_19 : f32 to vector<4x17xf32>
    %c0_20 = arith.constant 0 : index
    %c0_21 = arith.constant 0 : index
    %38 = vector.load %arg13[%c0_20, %c0_21] : memref<4x290xf32, #tpu.memory_space<vmem>>, vector<4x17xf32>
    tpu.vector_store %arg13[%c0_20, %c0_21], %37 {strides = array<i32>} : memref<4x290xf32, #tpu.memory_space<vmem>>, vector<4x17xf32>,
    %c0_22 = arith.constant 0 : index
    %c273 = arith.constant 273 : index
    %39 = vector.load %arg13[%c0_22, %c273] : memref<4x290xf32, #tpu.memory_space<vmem>>, vector<4x17xf32>
    tpu.vector_store %arg13[%c0_22, %c273], %37 {strides = array<i32>} : memref<4x290xf32, #tpu.memory_space<vmem>>, vector<4x17xf32>,
    %c0_23 = arith.constant 0 : index
    %c17 = arith.constant 17 : index
    %40 = vector.load %arg13[%c0_23, %c17] : memref<4x290xf32, #tpu.memory_space<vmem>>, vector<4x256xf32>
    tpu.vector_store %arg13[%c0_23, %c17], %36 {strides = array<i32>} : memref<4x290xf32, #tpu.memory_space<vmem>>, vector<4x256xf32>,
    %41 = tpu.iota {dimensions = array<i32: 1>} : vector<1x256xi32>
    %c16_i32 = arith.constant 16 : i32
    %c0_i32 = arith.constant 0 : i32
    %42 = arith.cmpi eq, %c16_i32, %c0_i32 : i32
    %c1_i32 = arith.constant 1 : i32
    %43 = arith.select %42, %c1_i32, %c16_i32 : i32
    %44 = vector.broadcast %43 : i32 to vector<1x256xi32>
    %45 = arith.remsi %41, %44 : vector<1x256xi32>
    %c0_i32_24 = arith.constant 0 : i32
    %46 = vector.broadcast %c0_i32_24 : i32 to vector<1x256xi32>
    %47 = arith.cmpi ne, %45, %46 : vector<1x256xi32>
    %c0_i32_25 = arith.constant 0 : i32
    %48 = vector.broadcast %c0_i32_25 : i32 to vector<1x256xi32>
    %49 = arith.cmpi slt, %45, %48 : vector<1x256xi32>
    %c0_i32_26 = arith.constant 0 : i32
    %50 = arith.cmpi slt, %43, %c0_i32_26 : i32
    %51 = vector.broadcast %50 : i1 to vector<1x256xi1>
    %52 = vector.broadcast %51 : vector<1x256xi1> to vector<1x256xi1>
    %53 = arith.xori %49, %52 : vector<1x256xi1>
    %54 = arith.andi %53, %47 : vector<1x256xi1>
    %55 = vector.broadcast %43 : i32 to vector<1x256xi32>
    %56 = arith.addi %45, %55 : vector<1x256xi32>
    %57 = arith.select %54, %56, %45 : vector<1x256xi1>, vector<1x256xi32>
    %c1_i32_27 = arith.constant 1 : i32
    %58 = vector.broadcast %c1_i32_27 : i32 to vector<1x256xi32>
    %59 = arith.cmpi sge, %57, %58 : vector<1x256xi32>
    %c15_i32 = arith.constant 15 : i32
    %60 = vector.broadcast %c15_i32 : i32 to vector<1x256xi32>
    %61 = arith.cmpi slt, %57, %60 : vector<1x256xi32>
    %c0_28 = arith.constant 0 : index
    %c0_29 = arith.constant 0 : index
    %62 = vector.load %arg13[%c0_28, %c0_29] : memref<4x290xf32, #tpu.memory_space<vmem>>, vector<4x256xf32>
    %cst_30 = arith.constant 0.000000e+00 : f32
    %63 = vector.shape_cast %59 : vector<1x256xi1> to vector<1x256xi1>
    %64 = vector.broadcast %63 : vector<1x256xi1> to vector<4x256xi1>
    %65 = vector.broadcast %cst_30 : f32 to vector<4x256xf32>
    %66 = arith.select %64, %62, %65 : vector<4x256xi1>, vector<4x256xf32>
    %c0_31 = arith.constant 0 : index
    %c1 = arith.constant 1 : index
    %67 = vector.load %arg13[%c0_31, %c1] : memref<4x290xf32, #tpu.memory_space<vmem>>, vector<4x256xf32>
    %c0_32 = arith.constant 0 : index
    %c2 = arith.constant 2 : index
    %68 = vector.load %arg13[%c0_32, %c2] : memref<4x290xf32, #tpu.memory_space<vmem>>, vector<4x256xf32>
    %cst_33 = arith.constant 0.000000e+00 : f32
    %69 = vector.shape_cast %61 : vector<1x256xi1> to vector<1x256xi1>
    %70 = vector.broadcast %69 : vector<1x256xi1> to vector<4x256xi1>
    %71 = vector.broadcast %cst_33 : f32 to vector<4x256xf32>
    %72 = arith.select %70, %68, %71 : vector<4x256xi1>, vector<4x256xf32>
    %c0_34 = arith.constant 0 : index
    %c16 = arith.constant 16 : index
    %73 = vector.load %arg13[%c0_34, %c16] : memref<4x290xf32, #tpu.memory_space<vmem>>, vector<4x256xf32>
    %cst_35 = arith.constant 0.000000e+00 : f32
    %74 = vector.shape_cast %59 : vector<1x256xi1> to vector<1x256xi1>
    %75 = vector.broadcast %74 : vector<1x256xi1> to vector<4x256xi1>
    %76 = vector.broadcast %cst_35 : f32 to vector<4x256xf32>
    %77 = arith.select %75, %73, %76 : vector<4x256xi1>, vector<4x256xf32>
    %c0_36 = arith.constant 0 : index
    %c17_37 = arith.constant 17 : index
    %78 = vector.load %arg13[%c0_36, %c17_37] : memref<4x290xf32, #tpu.memory_space<vmem>>, vector<4x256xf32>
    %c0_38 = arith.constant 0 : index
    %c18 = arith.constant 18 : index
    %79 = vector.load %arg13[%c0_38, %c18] : memref<4x290xf32, #tpu.memory_space<vmem>>, vector<4x256xf32>
    %cst_39 = arith.constant 0.000000e+00 : f32
    %80 = vector.shape_cast %61 : vector<1x256xi1> to vector<1x256xi1>
    %81 = vector.broadcast %80 : vector<1x256xi1> to vector<4x256xi1>
    %82 = vector.broadcast %cst_39 : f32 to vector<4x256xf32>
    %83 = arith.select %81, %79, %82 : vector<4x256xi1>, vector<4x256xf32>
    %c0_40 = arith.constant 0 : index
    %c32 = arith.constant 32 : index
    %84 = vector.load %arg13[%c0_40, %c32] : memref<4x290xf32, #tpu.memory_space<vmem>>, vector<4x256xf32>
    %cst_41 = arith.constant 0.000000e+00 : f32
    %85 = vector.shape_cast %59 : vector<1x256xi1> to vector<1x256xi1>
    %86 = vector.broadcast %85 : vector<1x256xi1> to vector<4x256xi1>
    %87 = vector.broadcast %cst_41 : f32 to vector<4x256xf32>
    %88 = arith.select %86, %84, %87 : vector<4x256xi1>, vector<4x256xf32>
    %c0_42 = arith.constant 0 : index
    %c33 = arith.constant 33 : index
    %89 = vector.load %arg13[%c0_42, %c33] : memref<4x290xf32, #tpu.memory_space<vmem>>, vector<4x256xf32>
    %c0_43 = arith.constant 0 : index
    %c34 = arith.constant 34 : index
    %90 = vector.load %arg13[%c0_43, %c34] : memref<4x290xf32, #tpu.memory_space<vmem>>, vector<4x256xf32>
    %cst_44 = arith.constant 0.000000e+00 : f32
    %91 = vector.shape_cast %61 : vector<1x256xi1> to vector<1x256xi1>
    %92 = vector.broadcast %91 : vector<1x256xi1> to vector<4x256xi1>
    %93 = vector.broadcast %cst_44 : f32 to vector<4x256xf32>
    %94 = arith.select %92, %90, %93 : vector<4x256xi1>, vector<4x256xf32>
    %95 = tpu.concatenate %66, %67, %72, %77, %78, %83, %88, %89, %94 in 0 : vector<4x256xf32>, vector<4x256xf32>, vector<4x256xf32>, vector<4x256xf32>, vector<4x256xf32>, vector<4x256xf32>, vector<4x256xf32>, vector<4x256xf32>, vector<4x256xf32> -> vector<36x256xf32>
    %96 = arith.truncf %95 : vector<36x256xf32> to vector<36x256xbf16>
    %c0_45 = arith.constant 0 : index
    %c0_46 = arith.constant 0 : index
    %97 = vector.load %arg6[%c0_45, %c0_46] : memref<4x36xbf16, #tpu.memory_space<vmem>>, vector<4x36xbf16>
    %cst_47 = arith.constant dense<0.000000e+00> : vector<4x256xf32>
    %98 = tpu.matmul %97, %96, %cst_47 {dimension_numbers = #tpu.dot_dimension_numbers<[1], [0], [0], [1], [0, 0, 1, 1], [], []>} : vector<4x36xbf16>, vector<36x256xbf16>, vector<4x256xf32> -> vector<4x256xf32>
    %c0_48 = arith.constant 0 : index
    %c0_49 = arith.constant 0 : index
    %99 = vector.load %arg7[%c0_48, %c0_49] : memref<4x1xf32, #tpu.memory_space<vmem>>, vector<4x1xf32>
    %100 = vector.broadcast %99 : vector<4x1xf32> to vector<4x256xf32>
    %101 = arith.addf %98, %100 : vector<4x256xf32>
    %cst_50 = arith.constant 5.000000e-01 : f32
    %102 = vector.broadcast %cst_50 : f32 to vector<4x256xf32>
    %103 = arith.mulf %102, %101 : vector<4x256xf32>
    %104 = math.tanh %103 : vector<4x256xf32>
    %cst_51 = arith.constant 5.000000e-01 : f32
    %105 = vector.broadcast %cst_51 : f32 to vector<4x256xf32>
    %106 = arith.mulf %105, %104 : vector<4x256xf32>
    %cst_52 = arith.constant 5.000000e-01 : f32
    %107 = vector.broadcast %cst_52 : f32 to vector<4x256xf32>
    %108 = arith.addf %107, %106 : vector<4x256xf32>
    %109 = arith.mulf %101, %108 : vector<4x256xf32>
    %110 = arith.addf %16, %109 : vector<4x256xf32>
    %c0_53 = arith.constant 0 : index
    %c0_54 = arith.constant 0 : index
    %111 = vector.load %arg8[%c0_53, %c0_54] : memref<4x4xbf16, #tpu.memory_space<vmem>>, vector<4x4xbf16>
    %112 = arith.truncf %110 : vector<4x256xf32> to vector<4x256xbf16>
    %cst_55 = arith.constant dense<0.000000e+00> : vector<4x256xf32>
    %113 = tpu.matmul %111, %112, %cst_55 {dimension_numbers = #tpu.dot_dimension_numbers<[1], [0], [0], [1], [0, 0, 1, 1], [], []>} : vector<4x4xbf16>, vector<4x256xbf16>, vector<4x256xf32> -> vector<4x256xf32>
    %c0_56 = arith.constant 0 : index
    %c0_57 = arith.constant 0 : index
    %114 = vector.load %arg9[%c0_56, %c0_57] : memref<4x1xf32, #tpu.memory_space<vmem>>, vector<4x1xf32>
    %115 = vector.broadcast %114 : vector<4x1xf32> to vector<4x256xf32>
    %116 = arith.addf %113, %115 : vector<4x256xf32>
    %cst_58 = arith.constant 0.000000e+00 : f32
    %117 = vector.broadcast %cst_58 : f32 to vector<4x256xf32>
    %118 = arith.cmpf ogt, %116, %117 : vector<4x256xf32>
    %cst_59 = arith.constant 1.000000e-01 : f32
    %119 = vector.broadcast %cst_59 : f32 to vector<4x256xf32>
    %120 = arith.mulf %119, %116 : vector<4x256xf32>
    %121 = arith.select %118, %116, %120 : vector<4x256xi1>, vector<4x256xf32>
    %122 = tpu.concatenate %121, %22 in 0 : vector<4x256xf32>, vector<4x256xf32> -> vector<8x256xf32>
    %123 = arith.truncf %122 : vector<8x256xf32> to vector<8x256xbf16>
    %c0_60 = arith.constant 0 : index
    %c0_61 = arith.constant 0 : index
    %124 = vector.load %arg10[%c0_60, %c0_61] : memref<8x8xbf16, #tpu.memory_space<vmem>>, vector<8x8xbf16>
    %cst_62 = arith.constant dense<0.000000e+00> : vector<8x256xf32>
    %125 = tpu.matmul %124, %123, %cst_62 {dimension_numbers = #tpu.dot_dimension_numbers<[1], [0], [0], [1], [0, 0, 1, 1], [], []>} : vector<8x8xbf16>, vector<8x256xbf16>, vector<8x256xf32> -> vector<8x256xf32>
    %c0_63 = arith.constant 0 : index
    %c0_64 = arith.constant 0 : index
    %126 = vector.load %arg11[%c0_63, %c0_64] : memref<8x1xf32, #tpu.memory_space<vmem>>, vector<8x1xf32>
    %127 = vector.broadcast %126 : vector<8x1xf32> to vector<8x256xf32>
    %128 = arith.addf %125, %127 : vector<8x256xf32>
    %cst_65 = arith.constant 5.000000e-01 : f32
    %129 = vector.broadcast %cst_65 : f32 to vector<8x256xf32>
    %130 = arith.mulf %129, %128 : vector<8x256xf32>
    %131 = math.tanh %130 : vector<8x256xf32>
    %cst_66 = arith.constant 5.000000e-01 : f32
    %132 = vector.broadcast %cst_66 : f32 to vector<8x256xf32>
    %133 = arith.mulf %132, %131 : vector<8x256xf32>
    %cst_67 = arith.constant 5.000000e-01 : f32
    %134 = vector.broadcast %cst_67 : f32 to vector<8x256xf32>
    %135 = arith.addf %134, %133 : vector<8x256xf32>
    %136 = arith.mulf %128, %135 : vector<8x256xf32>
    %c0_68 = arith.constant 0 : index
    %c0_69 = arith.constant 0 : index
    %c0_70 = arith.constant 0 : index
    %137 = vector.load %arg12[%c0_68, %c0_69, %c0_70] : memref<1x8x256xf32, #tpu.memory_space<vmem>>, vector<1x8x256xf32>
    %138 = vector.shape_cast %137 : vector<1x8x256xf32> to vector<8x256xf32>
    %139 = vector.shape_cast %136 : vector<8x256xf32> to vector<1x8x256xf32>
    tpu.vector_store %arg12[%c0_68, %c0_69, %c0_70], %139 {strides = array<i32>} : memref<1x8x256xf32, #tpu.memory_space<vmem>>, vector<1x8x256xf32>,
    return
  }
  func.func @transform_0(%arg0: i32) -> (i32, i32, i32) {
    %c0_i32 = arith.constant 0 : i32
    %c0_i32_0 = arith.constant 0 : i32
    %c0_i32_1 = arith.constant 0 : i32
    return %arg0, %c0_i32, %c0_i32_0 : i32, i32, i32
  }
  func.func @transform_1(%arg0: i32) -> (i32, i32) {
    %c0_i32 = arith.constant 0 : i32
    %c0_i32_0 = arith.constant 0 : i32
    %c0_i32_1 = arith.constant 0 : i32
    return %c0_i32, %c0_i32_0 : i32, i32
  }
  func.func @transform_2(%arg0: i32) -> (i32, i32) {
    %c0_i32 = arith.constant 0 : i32
    %c0_i32_0 = arith.constant 0 : i32
    %c0_i32_1 = arith.constant 0 : i32
    return %c0_i32, %c0_i32_0 : i32, i32
  }
  func.func @transform_3(%arg0: i32) -> (i32, i32) {
    %c0_i32 = arith.constant 0 : i32
    %c0_i32_0 = arith.constant 0 : i32
    %c0_i32_1 = arith.constant 0 : i32
    return %c0_i32, %c0_i32_0 : i32, i32
  }
  func.func @transform_4(%arg0: i32) -> (i32, i32) {
    %c0_i32 = arith.constant 0 : i32
    %c0_i32_0 = arith.constant 0 : i32
    %c0_i32_1 = arith.constant 0 : i32
    return %c0_i32, %c0_i32_0 : i32, i32
  }
  func.func @transform_5(%arg0: i32) -> (i32, i32) {
    %c0_i32 = arith.constant 0 : i32
    %c0_i32_0 = arith.constant 0 : i32
    %c0_i32_1 = arith.constant 0 : i32
    return %c0_i32, %c0_i32_0 : i32, i32
  }
  func.func @transform_6(%arg0: i32) -> (i32, i32) {
    %c0_i32 = arith.constant 0 : i32
    %c0_i32_0 = arith.constant 0 : i32
    %c0_i32_1 = arith.constant 0 : i32
    return %c0_i32, %c0_i32_0 : i32, i32
  }
  func.func @transform_7(%arg0: i32) -> (i32, i32) {
    %c0_i32 = arith.constant 0 : i32
    %c0_i32_0 = arith.constant 0 : i32
    %c0_i32_1 = arith.constant 0 : i32
    return %c0_i32, %c0_i32_0 : i32, i32
  }
  func.func @transform_8(%arg0: i32) -> (i32, i32) {
    %c0_i32 = arith.constant 0 : i32
    %c0_i32_0 = arith.constant 0 : i32
    %c0_i32_1 = arith.constant 0 : i32
    return %c0_i32, %c0_i32_0 : i32, i32
  }
  func.func @transform_9(%arg0: i32) -> (i32, i32) {
    %c0_i32 = arith.constant 0 : i32
    %c0_i32_0 = arith.constant 0 : i32
    %c0_i32_1 = arith.constant 0 : i32
    return %c0_i32, %c0_i32_0 : i32, i32
  }
  func.func @transform_10(%arg0: i32) -> (i32, i32) {
    %c0_i32 = arith.constant 0 : i32
    %c0_i32_0 = arith.constant 0 : i32
    %c0_i32_1 = arith.constant 0 : i32
    return %c0_i32, %c0_i32_0 : i32, i32
  }
  func.func @transform_11(%arg0: i32) -> (i32, i32, i32) {
    %c0_i32 = arith.constant 0 : i32
    %c0_i32_0 = arith.constant 0 : i32
    %c0_i32_1 = arith.constant 0 : i32
    return %arg0, %c0_i32, %c0_i32_0 : i32, i32, i32
  }
}

</mosaic_0001>

<bundles_post_ra>
// kernel: bottleneck_csp_forward.1
= control target key start
LH: loop header
LB: loop body
LE: loop exit
PB: predicated region body
PF: predicated region fallthrough
CT: control target
= control target key end

     0   :  { %s1178_s17 = smov 0   ;;  %s1353_s0 = inlined_call_operand.vmem [shape: f32[2,4,256], index: 0, kind: input, shape index: {}]   ;;  %s1354_s1 = inlined_call_operand.vmem [shape: bf16[8,4], index: 1, kind: input, shape index: {}]   ;;  %s1355_s2 = inlined_call_operand.vmem [shape: f32[8,1], index: 2, kind: input, shape index: {}]   ;;  %s1356_s3 = inlined_call_operand.vmem [shape: bf16[4,4], index: 3, kind: input, shape index: {}]   ;;  %s1357_s4 = inlined_call_operand.vmem [shape: f32[4,1], index: 4, kind: input, shape index: {}]   ;;  %s1358_s5 = inlined_call_operand.vmem [shape: bf16[4,36], index: 5, kind: input, shape index: {}]   ;;  %s1359_s6 = inlined_call_operand.vmem [shape: f32[4,1], index: 6, kind: input, shape index: {}]   ;;  %s1360_s7 = inlined_call_operand.vmem [shape: bf16[4,4], index: 7, kind: input, shape index: {}]   ;;  %s1361_s8 = inlined_call_operand.vmem [shape: f32[4,1], index: 8, kind: input, shape index: {}]   ;;  %s1362_s9 = inlined_call_operand.vmem [shape: bf16[8,8], index: 9, kind: input, shape index: {}]   ;;  %s1363_s10 = inlined_call_operand.vmem [shape: f32[8,1], index: 10, kind: input, shape index: {}]   ;;  %s1364_s11 = inlined_call_operand.vmem [shape: f32[2,8,256], index: 11, kind: output, shape index: {}]  }
   0x1 LB: > { %s995_s18 = sadd.s32 4294967295, %s1105_s17   ;;  %p999_p0 = scmp.ge.s32.totalorder %s1105_s17, 1  ;;  %s1105_s17 = sphi %s1178_s17, %s21_s17  }
   0x2   : > { %p337_p1 = scmp.lt.s32.totalorder %s1105_s17, 3 }
   0x4   : > { %p338_p2 = pnand %p999_p0, %p337_p1 }
   0x5   : > { %p377_p3 = scmp.lt.s32.totalorder (!%p338_p2), %s995_s18, 1  ;;  %v1107_v0 = vmov (!%p338_p2), 0   ;;  %v395_v1 = vld [vmem:[%s1355_s2] sm:$0xff] (!%p338_p2)  ;;  %vm405_vm0 = vcmask (!%p338_p2), 1041408   ;;  %vm401_vm1 = vcmask (!%p338_p2), 31744   ;;  %vm538_vm2 = vcmask (!%p338_p2), 134144  }
   0x6   : > { %341 = sbr.rel (%p338_p2) target bundleno = 1483 (0x5cb), region = 64  ;;  %444 = vmatprep.mubr.bf16.mxu0 (!%p338_p2), %v1107_v0  ;;  %1037 = vset.pattern.permute.xlu0 (!%p338_p2), %v1107_v0  ;;  %v472_v2 = vld [vmem:[%s1357_s4] sm:$0xf] (!%p338_p2)  ;;  %vm540_vm3 = vcmask (!%p338_p2), 273544   ;;  %v1108_v30 = vmov (!%p338_p2), 0.0   ;;  %s1109_s12 = smov (!%p338_p2), 17   ;;  %v557_v63 = vlaneseq (!%p338_p2) }
   0x7   : > { %398 = vperm.xlu0 (!%p338_p2), %1037, %v395_v1   ;;  %519 = vmatprep.mubr.bf16.mxu1 (!%p338_p2), %v1107_v0  ;;  %v394_v8 = vld [vmem:[%s1354_s1] sm:$0xf] (!%p338_p2)  ;;  %539 = vst.msk [vmem:[#allocation2] sm:$0xf] (!%p338_p2), %vm538_vm2, %v1108_v30  ;;  %vm552_vm4 = vcmask (!%p338_p2), 1043592   ;;  %vm553_vm5 = vcmask (!%p338_p2), 1047556  }
   0x8   : > { %1078 = vset.pattern.permute.xlu1 (!%p338_p2), %v1107_v0  ;;  %v469_v29 = vld [vmem:[%s1356_s3] sm:$0x3] (!%p338_p2)  ;;  %541 = vst.msk [vmem:[#allocation2 + $0x8] sm:$0xf] (!%p338_p2), %vm540_vm3, %v1108_v30  ;;  %vm548_vm6 = vcmask (!%p338_p2), 138240   ;;  %vm554_vm7 = vmor (!%p338_p2), %vm553_vm5, %vm552_vm4  ;;  %s1110_s13 = smov (!%p338_p2), 111  }
   0x9   : > { %s1111_s14 = smov (!%p338_p2), 112   ;;  %s1112_s15 = smov (!%p338_p2), 127   ;;  %v804_v60 = vld [vmem:[%s1361_s8] sm:$0xf] (!%p338_p2)  ;;  %v558_v1 = vand.u32 (!%p338_p2), 127, %v557_v63  ;;  %vm623_vm8 = vcmask (!%p338_p2), 916480  }
   0xa   : > { %s1113_s16 = smov (!%p338_p2), 126   ;;  %s1114_s19 = smov (!%p338_p2), 110   ;;  %v732_v61 = vld [vmem:[%s1359_s6] sm:$0xf] (!%p338_p2)  ;;  %vm610_vm12 = vcmask (!%p338_p2), 1031168   ;;  %vm677_vm13 = vcmask (!%p338_p2), 1039360  }
   0xb   : > { %475 = vperm.xlu0 (!%p338_p2), %1037, %v472_v2   ;;  %s1115_s20 = smov (!%p338_p2), 96   ;;  %s1116_s21 = smov (!%p338_p2), 95   ;;  %v871_v62 = vld [vmem:[%s1363_s10] sm:$0xff] (!%p338_p2)  ;;  %vm716_vm15 = vcmask (!%p338_p2), 1043456   ;;  %vm649_vm3 = vcmask (!%p338_p2), 785408   ;;  %vm711_vm4 = vcmask (!%p338_p2), 777216  }
   0xc   : > { %s1117_s22 = smov (!%p338_p2), 94   ;;  %vm694_vm5 = vcmask (!%p338_p2), 908288  }
   0xd   : > { %s1374_s18 = smov (!%p377_p3, %s995_s18), 1 }
   0xe   : > { %s1016_s23 = sshll.u32 %s1374_s18, 3 }
   0xf   : > { %s381_s26 = scalar_lea.vmem %s1353_s0, %s1016_s23 }
  0x10   : > { %v388_v3 = vld [vmem:[%s381_s26] sm:$0xff] }
  0x11   : > { %v390_v4 = vcombine.high %v388_v3, %v388_v3  ;;  %v392_v5 = vpack.c.bf16 %v388_v3, %v388_v3 }
  0x13   : > { %v393_v6 = vpack.c.bf16 %v390_v4, %v390_v4  ;;  %v407_v7 = vsel %vm405_vm0, %v392_v5, 0  ;;  %v559_v4 = vadd.s32 128, %v558_v1 }
  0x15   : > { %1004 = vmatprep.subr.msk.bf16.mxu0 %vm405_vm0, %v393_v6 }
  0x16   : > { %413 = vmatpush1.bf16.msra.mxu0 %v407_v7  ;;  %v564_v7 = vand.u32 15, %v558_v1 }
  0x18   : > { %vm1262_vm9 = vcmp.ge.s32.totalorder %v564_v7, 1  ;;  %vm1272_vm11 = vcmp.lt.s32.totalorder %v564_v7, 15 }
  0x19   : > { %1005 = vmatmul.mubr.msk.bf16.vlgmr.msra.gmra.mrb[0].mxu0 %vm401_vm1, %v394_v8  ;;  %v571_v8 = vand.u32 15, %v559_v4 }
  0x1a   : > { %780 = vmatprep.mubr.bf16.mxu0 %v1107_v0 }
  0x1b   : > { %vm1266_vm10 = vcmp.ge.s32.totalorder %v571_v8, 1  ;;  %vm1278_vm14 = vcmp.lt.s32.totalorder %v571_v8, 15 }
  0x86   : > { %v399_v9 = vpop.permute.xlu0 %398 }
  0x8a   : > { %v476_v31 = vpop.permute.xlu0 %475 }
  0xec   : > { %v446_v10 = vpop.f32.mrb[0].mxu0 }
  0xed   : > { %v1209_v11 = vadd.f32 %v446_v10, %v399_v9  ;;  %v448_v12 = vpop.f32.mrb[1].mxu0 }
  0xee   : > { %v1211_v13 = vadd.f32 %v448_v12, %v399_v9  ;;  %v450_v14 = vpop.f32.mrb[2].mxu0 }
  0xef   : > { %v451_v15 = vpop.f32.mrb[3].mxu0  ;;  %v453_v16 = vmul.f32 0.5, %v1209_v11 }
  0xf0   : > { %v454_v17 = vmul.f32 0.5, %v1211_v13 }
  0xf1   : > { %1083 = vtanh.f32 %v453_v16 }
  0xf2   : > { %1085 = vtanh.f32 %v454_v17 }
  0xfb   : > { %v1084_v18 = vpop.eup %1083 }
  0xfc   : > { %v1086_v19 = vpop.eup %1085  ;;  %v457_v20 = vmul.f32 0.5, %v1084_v18 }
  0xfd   : > { %v458_v21 = vmul.f32 0.5, %v1086_v19 }
  0xfe   : > { %v459_v22 = vadd.f32 0.5, %v457_v20 }
  0xff   : > { %v460_v23 = vadd.f32 0.5, %v458_v21 }
 0x100   : > { %v1216_v24 = vmul.f32 %v459_v22, %v1209_v11 }
 0x101   : > { %v1219_v25 = vmul.f32 %v460_v23, %v1211_v13 }
 0x102   : > { %v470_v26 = vpack.c.bf16 %v1216_v24, %v1216_v24 }
 0x103   : > { %v471_v27 = vpack.c.bf16 %v1219_v25, %v1219_v25 }
 0x104   : > { %v482_v28 = vsel %vm405_vm0, %v470_v26, 0 }
 0x105   : > { %1006 = vmatprep.subr.msk.bf16.mxu1 %vm405_vm0, %v471_v27 }
 0x106   : > { %488 = vmatpush1.bf16.msra.mxu1 %v482_v28 }
 0x109   : > { %1007 = vmatmul.mubr.msk.bf16.vlgmr.msra.gmra.mrb[0].mxu1 %vm401_vm1, %v469_v29 }
 0x10a   : > { %851 = vmatprep.mubr.bf16.mxu1 %v1107_v0 }
 0x1dc   : > { %v521_v32 = vpop.f32.mrb[0].mxu1 }
 0x1dd   : > { %v522_v33 = vadd.f32 %v521_v32, %v476_v31  ;;  %v523_v34 = vpop.f32.mrb[1].mxu1 }
 0x1de   : > { %v524_v35 = vadd.f32 %v523_v34, %v476_v31  ;;  %v525_v36 = vpop.f32.mrb[2].mxu1 }
 0x1df   : > { %v528_v37 = vmul.f32 0.5, %v522_v33  ;;  %v526_v38 = vpop.f32.mrb[3].mxu1 }
 0x1e0   : > { %v529_v39 = vmul.f32 0.5, %v524_v35 }
 0x1e1   : > { %1087 = vtanh.f32 %v528_v37 }
 0x1e2   : > { %1089 = vtanh.f32 %v529_v39 }
 0x1eb   : > { %v1088_v40 = vpop.eup %1087 }
 0x1ec   : > { %v1090_v41 = vpop.eup %1089  ;;  %v532_v42 = vmul.f32 0.5, %v1088_v40 }
 0x1ed   : > { %v533_v43 = vmul.f32 0.5, %v1090_v41 }
 0x1ee   : > { %v534_v44 = vadd.f32 0.5, %v532_v42 }
 0x1ef   : > { %v535_v45 = vadd.f32 0.5, %v533_v43 }
 0x1f0   : > { %v536_v46 = vmul.f32 %v534_v44, %v522_v33 }
 0x1f1   : > { %v537_v47 = vmul.f32 %v535_v45, %v524_v35 }
 0x1f3   : > { %v544_v48 = vcombine.low %v536_v46, %v537_v47 }
 0x1f5   : > { %545 = vrot.lane.b32.xlu1 %v544_v48, %s1109_s12 }
 0x267   : > { %v546_v49 = vpop.permute.xlu1 %545 }
 0x268   : > { %v547_v50 = vrot.slane %v546_v49, 4 }
 0x26a   : > { %v549_v51 = vsel %vm548_vm6, %v547_v50, %v546_v49  ;;  %556 = vst.msk [vmem:[#allocation2 + $0x8] sm:$0xf] %vm538_vm2, %v547_v50  ;;  %vm636_vm2 = vcmask 900096   ;;  %vm662_vm6 = vcmask 769024  }
 0x26b   : > { %555 = vst.msk [vmem:[#allocation2] sm:$0xff] %vm554_vm7, %v549_v51  ;;  %vm738_vm7 = vcmask 293888  }
 0x271   : > { %v598_v52 = vld [vmem:[#allocation2 + $0x8] sm:$0xf] }
 0x272   : > { %v1234_v53 = vld [vmem:[#allocation2] sm:$0xff]  ;;  %v670_v54 = vcombine.low %v598_v52, %v598_v52 }
 0x273   : > { %688 = vrot.lane.b32.xlu1 %v1234_v53, %s1110_s13  ;;  %617 = vrot.lane.b32.xlu0 %v1234_v53, %s1111_s14  ;;  %v1241_v56 = vcombine.high %v1234_v53, %v1234_v53  ;;  %v669_v58 = vcombine.low %v1234_v53, %v1234_v53  ;;  %v596_v40 = vsel %vm1262_vm9, %v1234_v53, 0.0 }
 0x274   : > { %v1038_v55 = vpack.i.bf16 %v670_v54, %v1234_v53 }
 0x275   : > { %v1048_v57 = vpack.i.bf16 %v598_v52, %v1241_v56  ;;  %v1073_v59 = vpack.i.bf16 %v1241_v56, %v1234_v53  ;;  %v597_v43 = vsel %vm1266_vm10, %v1241_v56, 0.0 }
 0x277   : > { %1039 = vrot.lane.b32.xlu1 %v1038_v55, %s1112_s15  ;;  %604 = vrot.lane.b32.xlu0 %v1234_v53, %s1113_s16 }
 0x27b   : > { %630 = vrot.lane.b32.xlu0 %v1234_v53, %s1114_s19  ;;  %1049 = vrot.lane.b32.xlu1 %v1048_v57, %s1111_s14 }
 0x27f   : > { %643 = vrot.lane.b32.xlu0 %v1234_v53, %s1115_s20  ;;  %1054 = vrot.lane.b32.xlu1 %v1048_v57, %s1113_s16  ;;  %s1017_s16 = sshll.u32 %s1374_s18, 4 }
 0x283   : > { %1044 = vrot.lane.b32.xlu0 %v1038_v55, %s1116_s21  ;;  %671 = vrot.lane.b32.xlu1 %v669_v58, %s1112_s15 }
 0x287   : > { %1059 = vrot.lane.b32.xlu0 %v1048_v57, %s1114_s19  ;;  %1064 = vrot.lane.b32.xlu1 %v1048_v57, %s1115_s20 }
 0x28b   : > { %705 = vrot.lane.b32.xlu0 %v669_v58, %s1116_s21  ;;  %1069 = vrot.lane.b32.xlu1 %v1048_v57, %s1110_s13  ;;  %s386_s21 = scalar_lea.vmem %s1364_s11, %s1017_s16 }
 0x28f   : > { %660 = vrot.lane.b32.xlu0 %v598_v52, %s1117_s22  ;;  %1074 = vrot.lane.b32.xlu1 %v1073_v59, %s1117_s22 }
 0x293   : > { %807 = vperm.xlu0 %1037, %v804_v60   ;;  %735 = vperm.xlu1 %1078, %v732_v61  }
 0x297   : > { %874 = vperm.xlu1 %1078, %v871_v62  }
 0x2e5   : > { %v1260_v2 = vpop.permute.xlu1 %688  ;;  %v618_v3 = vpop.permute.xlu0 %617 }
 0x2e9   : > { %v1040_v5 = vpop.permute.xlu1 %1039  ;;  %v605_v6 = vpop.permute.xlu0 %604 }
 0x2ea   : > { %v1042_v17 = vunpack.i.h.bf16 %v1040_v5  ;;  %v1041_v18 = vunpack.i.l.bf16 %v1040_v5 }
 0x2ec   : > { %v679_v34 = vsel %vm677_vm13, %v1041_v18, %v1042_v17 }
 0x2ed   : > { %v631_v9 = vpop.permute.xlu0 %630  ;;  %v1050_v10 = vpop.permute.xlu1 %1049  ;;  %v718_v45 = vsel %vm716_vm15, %v597_v43, %v679_v34 }
 0x2ee   : > { %v1052_v12 = vunpack.i.h.bf16 %v1050_v10  ;;  %v1051_v14 = vunpack.i.l.bf16 %v1050_v10 }
 0x2f0   : > { %v624_v19 = vsel %vm623_vm8, %v618_v3, %v1051_v14  ;;  %v625_v20 = vsel %vm623_vm8, %v1051_v14, %v1052_v12 }
 0x2f1   : > { %v628_v21 = vsel %vm1262_vm9, %v624_v19, 0.0  ;;  %v644_v22 = vpop.permute.xlu0 %643  ;;  %v1055_v26 = vpop.permute.xlu1 %1054  ;;  %v629_v27 = vsel %vm1266_vm10, %v625_v20, 0.0 }
 0x2f2   : > { %v1057_v28 = vunpack.i.h.bf16 %v1055_v26  ;;  %v1056_v29 = vunpack.i.l.bf16 %v1055_v26  ;;  %v684_v31 = vrot.slane %v628_v21, 4  ;;  %v685_v35 = vrot.slane %v629_v27, 4 }
 0x2f4   : > { %v611_v32 = vsel %vm610_vm12, %v605_v6, %v1056_v29  ;;  %v612_v33 = vsel %vm610_vm12, %v1056_v29, %v1057_v28 }
 0x2f5   : > { %v615_v36 = vsel %vm1272_vm11, %v611_v32, 0.0  ;;  %v1045_v37 = vpop.permute.xlu0 %1044  ;;  %v672_v38 = vpop.permute.xlu1 %671  ;;  %v616_v39 = vsel %vm1278_vm14, %v612_v33, 0.0 }
 0x2f6   : > { %v678_v41 = vsel %vm677_vm13, %v672_v38, %v1041_v18  ;;  %v719_v42 = vsel %vm716_vm15, %v615_v36, %v684_v31  ;;  %v720_v46 = vsel %vm716_vm15, %v616_v39, %v685_v35  ;;  %v1047_v55 = vunpack.i.h.bf16 %v1045_v37  ;;  %v731_v35 = vld [vmem:[%s1358_s5] sm:$0x3] }
 0x2f7   : > { %v717_v44 = vsel %vm716_vm15, %v596_v40, %v678_v41  ;;  %v726_v48 = vpack.c.bf16 %v720_v46, %v718_v45  ;;  %v1046_v57 = vunpack.i.l.bf16 %v1045_v37 }
 0x2f8   : > { %v725_v47 = vpack.c.bf16 %v719_v42, %v717_v44 }
 0x2f9   : > { %v1060_v49 = vpop.permute.xlu0 %1059  ;;  %v1065_v50 = vpop.permute.xlu1 %1064  ;;  %748 = vmatprep.subr.bf16.mxu0 %v726_v48  ;;  %v713_v10 = vsel %vm711_vm4, %v1046_v57, %v1047_v55 }
 0x2fa   : > { %v1062_v51 = vunpack.i.h.bf16 %v1060_v49  ;;  %v1061_v52 = vunpack.i.l.bf16 %v1060_v49  ;;  %v1067_v53 = vunpack.i.h.bf16 %v1065_v50  ;;  %v1066_v54 = vunpack.i.l.bf16 %v1065_v50  ;;  %749 = vmatpush1.bf16.msra.mxu0 %v725_v47 }
 0x2fc   : > { %v637_v56 = vsel %vm636_vm2, %v631_v9, %v1061_v52  ;;  %v638_v58 = vsel %vm636_vm2, %v1061_v52, %v1062_v51  ;;  %v650_v59 = vsel %vm649_vm3, %v644_v22, %v1066_v54  ;;  %v651_v60 = vsel %vm649_vm3, %v1066_v54, %v1067_v53 }
 0x2fd   : > { %v641_v61 = vsel %vm1272_vm11, %v637_v56, 0.0  ;;  %v642_v62 = vsel %vm1278_vm14, %v638_v58, 0.0  ;;  %v706_v63 = vpop.permute.xlu0 %705  ;;  %v654_v1 = vsel %vm1262_vm9, %v650_v59, 0.0  ;;  %v1070_v3 = vpop.permute.xlu1 %1069  ;;  %v655_v4 = vsel %vm1266_vm10, %v651_v60, 0.0 }
 0x2fe   : > { %v701_v5 = vrot.slane %v641_v61, 4  ;;  %v702_v6 = vrot.slane %v642_v62, 4  ;;  %v712_v7 = vsel %vm711_vm4, %v706_v63, %v1046_v57  ;;  %v1072_v8 = vunpack.i.h.bf16 %v1070_v3  ;;  %v801_v57 = vld [vmem:[%s1360_s7] sm:$0x3] }
 0x2ff   : > { %v1071_v9 = vunpack.i.l.bf16 %v1070_v3  ;;  %v723_v12 = vsel %vm716_vm15, %v654_v1, %v712_v7  ;;  %v724_v16 = vsel %vm716_vm15, %v655_v4, %v713_v10  ;;  %v466_v60 = vmul.f32 0.1, %v1211_v13 }
 0x300   : > { %vm464_vm9 = vcmp.gt.f32.partialorder %v1211_v13, 0.0  ;;  %vm877_vm10 = vcmask 64512  }
 0x301   : > { %v695_v14 = vsel %vm694_vm5, %v1260_v2, %v1071_v9  ;;  %v696_v15 = vsel %vm694_vm5, %v1071_v9, %v1072_v8  ;;  %v1075_v17 = vpop.permute.xlu1 %1074  ;;  %v661_v22 = vpop.permute.xlu0 %660 }
 0x302   : > { %v1077_v18 = vunpack.i.h.bf16 %v1075_v17  ;;  %v1076_v19 = vunpack.i.l.bf16 %v1075_v17  ;;  %v722_v20 = vsel %vm716_vm15, %v696_v15, %v702_v6  ;;  %v721_v21 = vsel %vm716_vm15, %v695_v14, %v701_v5  ;;  %v870_v14 = vld [vmem:[%s1362_s9] sm:$0xf] }
 0x303   : > { %v728_v26 = vpack.c.bf16 %v724_v16, %v722_v20  ;;  %v727_v27 = vpack.c.bf16 %v723_v12, %v721_v21  ;;  %v468_v5 = vsel %vm464_vm9, %v1211_v13, %v466_v60 }
 0x304   : > { %v664_v28 = vsel %vm662_vm6, %v1077_v18, %v661_v22  ;;  %v663_v29 = vsel %vm662_vm6, %v1076_v19, %v1077_v18 }
 0x305   : > { %v668_v31 = vsel %vm1278_vm14, %v664_v28, 0.0  ;;  %750 = vmatprep.subr.bf16.mxu0 %v728_v26  ;;  %v667_v2 = vsel %vm1272_vm11, %v663_v29, 0.0 }
 0x306   : > { %751 = vmatpush1.bf16.msra.mxu0 %v727_v27  ;;  %v730_v32 = vpack.c.bf16 %v668_v31, %v668_v31  ;;  %v729_v33 = vpack.c.bf16 %v667_v2, %v667_v2 }
 0x308   : > { %1008 = vmatprep.subr.msk.bf16.mxu0 %vm405_vm0, %v730_v32  ;;  %v743_v34 = vsel %vm405_vm0, %v729_v33, 0 }
 0x30a   : > { %753 = vmatpush1.bf16.msra.mxu0 %v743_v34 }
 0x30d   : > { %1009 = vmatmul.mubr.msk.bf16.vlgmr.msra.gmra.mrb[4].mxu0 %vm738_vm7, %v731_v35 }
 0x312   : > { %v736_v30 = vpop.permute.xlu1 %735  ;;  %v808_v56 = vpop.permute.xlu0 %807 }
 0x3e0   : > { %v782_v36 = vpop.f32.mrb[4].mxu0 }
 0x3e1   : > { %v783_v37 = vadd.f32 %v782_v36, %v736_v30  ;;  %v784_v38 = vpop.f32.mrb[5].mxu0 }
 0x3e2   : > { %v785_v23 = vadd.f32 %v784_v38, %v736_v30  ;;  %v786_v39 = vpop.f32.mrb[6].mxu0 }
 0x3e3   : > { %v789_v40 = vmul.f32 0.5, %v783_v37  ;;  %v787_v41 = vpop.f32.mrb[7].mxu0 }
 0x3e4   : > { %v790_v42 = vmul.f32 0.5, %v785_v23 }
 0x3e5   : > { %1091 = vtanh.f32 %v789_v40 }
 0x3e6   : > { %1093 = vtanh.f32 %v790_v42 }
 0x3ef   : > { %v1092_v43 = vpop.eup %1091 }
 0x3f0   : > { %v1094_v44 = vpop.eup %1093  ;;  %v793_v45 = vmul.f32 0.5, %v1092_v43 }
 0x3f1   : > { %v794_v46 = vmul.f32 0.5, %v1094_v44 }
 0x3f2   : > { %v795_v47 = vadd.f32 0.5, %v793_v45 }
 0x3f3   : > { %v796_v48 = vadd.f32 0.5, %v794_v46 }
 0x3f4   : > { %v797_v49 = vmul.f32 %v795_v47, %v783_v37 }
 0x3f5   : > { %v798_v50 = vmul.f32 %v796_v48, %v785_v23 }
 0x3f6   : > { %v799_v51 = vadd.f32 %v797_v49, %v1216_v24 }
 0x3f7   : > { %v800_v52 = vadd.f32 %v798_v50, %v1219_v25  ;;  %v465_v25 = vmul.f32 0.1, %v1209_v11 }
 0x3f8   : > { %v802_v53 = vpack.c.bf16 %v799_v51, %v799_v51 }
 0x3f9   : > { %v803_v54 = vpack.c.bf16 %v800_v52, %v800_v52 }
 0x3fa   : > { %v814_v55 = vsel %vm405_vm0, %v802_v53, 0 }
 0x3fb   : > { %1010 = vmatprep.subr.msk.bf16.mxu1 %vm405_vm0, %v803_v54  ;;  %vm463_vm0 = vcmp.gt.f32.partialorder %v1209_v11, 0.0 }
 0x3fc   : > { %820 = vmatpush1.bf16.msra.mxu1 %v814_v55  ;;  %v467_v4 = vsel %vm463_vm0, %v1209_v11, %v465_v25  ;;  %v875_v11 = vpop.permute.xlu1 %874 }
 0x3ff   : > { %1011 = vmatmul.mubr.msk.bf16.vlgmr.msra.gmra.mrb[4].mxu1 %vm401_vm1, %v801_v57 }
 0x400   : > { %919 = vmatprep.mubr.bf16.mxu1 %v1107_v0 }
 0x4d2   : > { %v853_v58 = vpop.f32.mrb[4].mxu1 }
 0x4d3   : > { %v854_v24 = vadd.f32 %v853_v58, %v808_v56  ;;  %v855_v59 = vpop.f32.mrb[5].mxu1 }
 0x4d4   : > { %v856_v61 = vadd.f32 %v855_v59, %v808_v56  ;;  %v857_v62 = vpop.f32.mrb[6].mxu1 }
 0x4d5   : > { %vm860_vm8 = vcmp.gt.f32.partialorder %v854_v24, 0.0  ;;  %v862_v63 = vmul.f32 0.1, %v854_v24  ;;  %v858_v1 = vpop.f32.mrb[7].mxu1 }
 0x4d6   : > { %vm861_vm1 = vcmp.gt.f32.partialorder %v856_v61, 0.0  ;;  %v863_v3 = vmul.f32 0.1, %v856_v61 }
 0x4d7   : > { %v864_v0 = vsel %vm860_vm8, %v854_v24, %v862_v63 }
 0x4d8   : > { %v865_v6 = vsel %vm861_vm1, %v856_v61, %v863_v3  ;;  %v866_v7 = vsel %vm716_vm15, %v864_v0, %v467_v4 }
 0x4d9   : > { %v867_v8 = vsel %vm716_vm15, %v865_v6, %v468_v5  ;;  %v868_v9 = vpack.c.bf16 %v866_v7, %v866_v7 }
 0x4da   : > { %v869_v10 = vpack.c.bf16 %v867_v8, %v867_v8 }
 0x4db   : > { %v882_v12 = vsel %vm716_vm15, %v868_v9, 0 }
 0x4dc   : > { %1012 = vmatprep.subr.msk.bf16.mxu1 %vm716_vm15, %v869_v10 }
 0x4dd   : > { %888 = vmatpush1.bf16.msra.mxu1 %v882_v12 }
 0x4e0   : > { %1013 = vmatmul.mubr.msk.bf16.vlgmr.msra.gmra.mrb[8].mxu1 %vm877_vm10, %v870_v14 }
 0x5b3   : > { %v921_v13 = vpop.f32.mrb[8].mxu1 }
 0x5b4   : > { %v922_v15 = vadd.f32 %v921_v13, %v875_v11  ;;  %v923_v17 = vpop.f32.mrb[9].mxu1 }
 0x5b5   : > { %v924_v16 = vadd.f32 %v923_v17, %v875_v11  ;;  %v925_v18 = vpop.f32.mrb[10].mxu1 }
 0x5b6   : > { %v928_v19 = vmul.f32 0.5, %v922_v15  ;;  %v926_v20 = vpop.f32.mrb[11].mxu1 }
 0x5b7   : > { %v929_v21 = vmul.f32 0.5, %v924_v16 }
 0x5b8   : > { %1095 = vtanh.f32 %v928_v19 }
 0x5b9   : > { %1097 = vtanh.f32 %v929_v21 }
 0x5c2   : > { %v1096_v22 = vpop.eup %1095 }
 0x5c3   : > { %v1098_v26 = vpop.eup %1097  ;;  %v932_v27 = vmul.f32 0.5, %v1096_v22 }
 0x5c4   : > { %v933_v28 = vmul.f32 0.5, %v1098_v26 }
 0x5c5   : > { %v934_v29 = vadd.f32 0.5, %v932_v27 }
 0x5c6   : > { %v935_v31 = vadd.f32 0.5, %v933_v28 }
 0x5c7   : > { %v936_v2 = vmul.f32 %v934_v29, %v922_v15 }
 0x5c8   : > { %v937_v32 = vmul.f32 %v935_v31, %v924_v16 }
 0x5c9   : > { %938 = vst [vmem:[%s386_s21] sm:$0xff] %v936_v2 }
 0x5ca   : > { %939 = vst [vmem:[%s386_s21 + $0x8] sm:$0xff] %v937_v32 }
 0x5cb PF: > { %s21_s17 = sadd.s32 1, %s1105_s17  }
 0x5cc   : > { %p18_p4 = scmp.ge.s32.totalorder %s21_s17, 4  }
 0x5ce   :  { %20 = sbr.rel (!%p18_p4) target bundleno = 1 (0x1), region = 94 }

</bundles_post_ra>
